<compile_context>
chip_gen: v6e
topology: v6e:2x2x1
jax: 0.10.0
libtpu: 0.0.40
codegen_flags: <defaults>
</compile_context>

<pallas_src>
import jax
import jax.numpy as jnp
from jax.experimental import pallas as pl
from jax.experimental.pallas import tpu as pltpu

# Module hyper-parameters (small, consistent with the reference module).
CLASS_NUM = 10
REFLECT = 3
LAYER_NUM = 3
CHANNEL = 32
IMG_SIZE = 16          # input feature dim = IMG_SIZE * IMG_SIZE = 256
BATCH = 16


def _sigmoid_f32(z):
    # sigma(z) = 0.5 * (tanh(z/2) + 1): numerically stable; tanh runs on the
    # (otherwise idle) EUP slot instead of a VPU divide chain.
    return 0.5 * jnp.tanh(0.5 * z) + 0.5


def lmser_kernel(x_ref,
                 w0t_ref, w1t_ref, w2t_ref,   # W_j.T : (256,32) f32, (32,32) bf16, (32,10) bf16
                 w0_ref, w1_ref, w2_ref,      # W_l   : (32,256), (32,32), (10,32) all bf16
                 o_ref):
    """One batch tile; full reflect/layer recurrence unrolled in-kernel."""
    enc_ws = [w0t_ref[...], w1t_ref[...], w2t_ref[...]]   # pre-transposed encoder weights
    dec_ws = [w0_ref[...], w1_ref[...], w2_ref[...]]      # decoder weights (tied)

    def matmul(a, w):
        # Plain (M,K)@(K,N): direct MXU feed, f32 accumulation.
        return jnp.dot(a, w, preferred_element_type=jnp.float32)

    x_bf = None                      # bf16 activation (cast once after sigmoid)
    x_f32 = None                     # f32 copy of the most recent sigmoid output
    recurrents = [None] * LAYER_NUM  # bf16 (None on the first reflect)

    for r in range(REFLECT):
        short_cut = []
        # ---------------- encoder sweep ----------------
        for j in range(LAYER_NUM):
            if j == 0:
                # Layer 0: unbounded inputs + K=256 reduction -> f32 matmul.
                if r == 0:
                    inp = x_ref[...].astype(jnp.float32)
                else:
                    inp = (x_bf + recurrents[0]).astype(jnp.float32)
                z = matmul(inp, enc_ws[0])
            else:
                inp = x_bf if recurrents[j] is None else x_bf + recurrents[j]
                z = matmul(inp, enc_ws[j])
            x_f32 = _sigmoid_f32(z)
            x_bf = x_f32.astype(jnp.bfloat16)
            short_cut.append(x_bf)
        # ---------------- decoder sweep ----------------
        new_rec = []
        for j in range(LAYER_NUM):
            l = LAYER_NUM - 1 - j
            z = matmul(x_bf + short_cut[l], dec_ws[l])
            x_f32 = _sigmoid_f32(z)
            x_bf = x_f32.astype(jnp.bfloat16)
            new_rec.append(x_bf)
        recurrents = new_rec[::-1]

    # Store the final decoder output from its f32 value (no extra bf16 round).
    o_ref[...] = x_f32.astype(o_ref.dtype)


def simple_lmser_pallas(x, weights, *, tile_b=None):
    """tile_b=None -> full batch in one grid step (best on v5e/v6e/v7x at this
    batch size: the kernel is latency-bound on an 18-deep serial matmul chain,
    so splitting the batch across grid steps / TensorCores buys nothing)."""
    B, D = x.shape
    w0, w1, w2 = weights
    if tile_b is None:
        tile_b = B
    assert B % tile_b == 0

    # Pre-transpose the encoder weights once, outside the kernel.  Encoder
    # layer 0 stays f32 for accuracy; everything else is bf16 (f32 accumulation
    # is kept inside the kernel via preferred_element_type).
    w0t = w0.T.astype(jnp.float32)    # (256, 32) f32
    w1t = w1.T.astype(jnp.bfloat16)   # (32, 32)
    w2t = w2.T.astype(jnp.bfloat16)   # (32, 10)
    w0b = w0.astype(jnp.bfloat16)     # (32, 256)
    w1b = w1.astype(jnp.bfloat16)     # (32, 32)
    w2b = w2.astype(jnp.bfloat16)     # (10, 32)
    weight_args = (w0t, w1t, w2t, w0b, w1b, w2b)
    # Constant-index specs: weights stay VMEM-resident across grid steps.
    weight_specs = [pl.BlockSpec(w.shape, lambda b: (0, 0)) for w in weight_args]

    # NOTE: total working set (x tile + 6 tiny weights) is well under 150 KiB,
    # so VMEM limits / pipeline depth are a non-issue on every generation
    # (incl. v7x's 64 MiB); no vmem_limit_bytes or Buffered() tuning needed.
    return pl.pallas_call(
        lmser_kernel,
        out_shape=jax.ShapeDtypeStruct((B, D), x.dtype),
        grid_spec=pltpu.PrefetchScalarGridSpec(
            num_scalar_prefetch=0,
            grid=(B // tile_b,),
            in_specs=[pl.BlockSpec((tile_b, D), lambda b: (b, 0))] + weight_specs,
            out_specs=pl.BlockSpec((tile_b, D), lambda b: (b, 0)),
        ),
        compiler_params=pltpu.CompilerParams(
            dimension_semantics=("parallel",)),
    )(x, *weight_args)


def simple_lmser_ref(x, weights):
    """Pure-JAX f32 mirror of the PyTorch forward (for correctness check)."""
    x = x.astype(jnp.float32)
    ws = [w.astype(jnp.float32) for w in weights]
    recurrent = [None] * LAYER_NUM
    for _ in range(REFLECT):
        short_cut = []
        for j in range(LAYER_NUM):
            inp = x if recurrent[j] is None else x + recurrent[j]
            x = jax.nn.sigmoid(inp @ ws[j].T)
            short_cut.append(x)
        new_rec = []
        for j in range(LAYER_NUM):
            l = LAYER_NUM - 1 - j
            x = jax.nn.sigmoid((x + short_cut[l]) @ ws[l])
            new_rec.append(x)
        recurrent = new_rec[::-1]
    return x


def init_weights(key):
    """Deterministic init mirroring __init__ shapes + set_DCW tying."""
    dims = []
    for i in range(LAYER_NUM):
        in_c, out_c = CHANNEL, CHANNEL
        if i == 0:
            in_c = IMG_SIZE * IMG_SIZE
        if i == LAYER_NUM - 1:
            out_c = CLASS_NUM
        dims.append((out_c, in_c))
    weights = []
    for (out_c, in_c) in dims:
        k_fc, k_dec, key = jax.random.split(key, 3)
        scale = 1.0 / jnp.sqrt(in_c)
        fc_w = jax.random.uniform(k_fc, (out_c, in_c), jnp.float32, -scale, scale)
        dec_w = jax.random.uniform(k_dec, (in_c, out_c), jnp.float32, -scale, scale)
        # set_DCW: fc.weight <- (fc.weight + dec.weight.T) / 2 ; dec.weight <- fc.weight.T
        w = (fc_w + dec_w.T) / 2.0
        weights.append(w)
    return weights


if __name__ == "__main__":
    key = jax.random.PRNGKey(0)
    k_x, k_w = jax.random.split(key)
    weights = init_weights(k_w)
    x = jax.random.normal(k_x, (BATCH, IMG_SIZE * IMG_SIZE), jnp.float32)

    out = jax.block_until_ready(simple_lmser_pallas(x, weights))
    ref = simple_lmser_ref(x, weights)

    assert out.shape == (BATCH, IMG_SIZE * IMG_SIZE)
    # bf16 weights/activations (f32 accumulation + f32 encoder layer 0) keep the
    # observed error around ~1e-3; 2e-2 gives comfortable margin.
    err = jnp.max(jnp.abs(out - ref))
    assert jnp.allclose(out, ref, atol=2e-2, rtol=0.0), f"max abs err = {err}"
    print("KERNEL_OK")
</pallas_src>

<mosaic_0001>
module attributes {stable_mosaic.version = 11 : i64} {
  func.func @lmser_kernel(%arg0: i32, %arg1: memref<16x256xf32, #tpu.memory_space<vmem>>, %arg2: memref<256x32xf32, #tpu.memory_space<vmem>>, %arg3: memref<32x32xbf16, #tpu.memory_space<vmem>>, %arg4: memref<32x10xbf16, #tpu.memory_space<vmem>>, %arg5: memref<32x256xbf16, #tpu.memory_space<vmem>>, %arg6: memref<32x32xbf16, #tpu.memory_space<vmem>>, %arg7: memref<10x32xbf16, #tpu.memory_space<vmem>>, %arg8: memref<16x256xf32, #tpu.memory_space<vmem>>) attributes {dimension_semantics = [#tpu.dimension_semantics<parallel>], iteration_bounds = array<i64: 1>, scalar_prefetch = 0 : i64, scratch_operands = 0 : i64, tpu.core_type = #tpu.core_type<tc>, window_params = [{transform_indices = @transform_0, window_bounds = array<i64: 16, 256>}, {pipeline_mode = #tpu.pipeline_mode<synchronous>, transform_indices = @transform_1, window_bounds = array<i64: 256, 32>}, {pipeline_mode = #tpu.pipeline_mode<synchronous>, transform_indices = @transform_2, window_bounds = array<i64: 32, 32>}, {pipeline_mode = #tpu.pipeline_mode<synchronous>, transform_indices = @transform_3, window_bounds = array<i64: 32, 10>}, {pipeline_mode = #tpu.pipeline_mode<synchronous>, transform_indices = @transform_4, window_bounds = array<i64: 32, 256>}, {pipeline_mode = #tpu.pipeline_mode<synchronous>, transform_indices = @transform_5, window_bounds = array<i64: 32, 32>}, {pipeline_mode = #tpu.pipeline_mode<synchronous>, transform_indices = @transform_6, window_bounds = array<i64: 10, 32>}, {transform_indices = @transform_7, window_bounds = array<i64: 16, 256>}]} {
    %c0 = arith.constant 0 : index
    %c0_0 = arith.constant 0 : index
    %0 = vector.load %arg2[%c0, %c0_0] : memref<256x32xf32, #tpu.memory_space<vmem>>, vector<256x32xf32>
    %c0_1 = arith.constant 0 : index
    %c0_2 = arith.constant 0 : index
    %1 = vector.load %arg3[%c0_1, %c0_2] : memref<32x32xbf16, #tpu.memory_space<vmem>>, vector<32x32xbf16>
    %c0_3 = arith.constant 0 : index
    %c0_4 = arith.constant 0 : index
    %2 = vector.load %arg4[%c0_3, %c0_4] : memref<32x10xbf16, #tpu.memory_space<vmem>>, vector<32x10xbf16>
    %c0_5 = arith.constant 0 : index
    %c0_6 = arith.constant 0 : index
    %3 = vector.load %arg5[%c0_5, %c0_6] : memref<32x256xbf16, #tpu.memory_space<vmem>>, vector<32x256xbf16>
    %c0_7 = arith.constant 0 : index
    %c0_8 = arith.constant 0 : index
    %4 = vector.load %arg6[%c0_7, %c0_8] : memref<32x32xbf16, #tpu.memory_space<vmem>>, vector<32x32xbf16>
    %c0_9 = arith.constant 0 : index
    %c0_10 = arith.constant 0 : index
    %5 = vector.load %arg7[%c0_9, %c0_10] : memref<10x32xbf16, #tpu.memory_space<vmem>>, vector<10x32xbf16>
    %c0_11 = arith.constant 0 : index
    %c0_12 = arith.constant 0 : index
    %6 = vector.load %arg1[%c0_11, %c0_12] : memref<16x256xf32, #tpu.memory_space<vmem>>, vector<16x256xf32>
    %cst = arith.constant dense<0.000000e+00> : vector<16x32xf32>
    %7 = tpu.matmul %6, %0, %cst {dimension_numbers = #tpu.dot_dimension_numbers<[1], [0], [0], [1], [0, 0, 1, 1], [], []>} : vector<16x256xf32>, vector<256x32xf32>, vector<16x32xf32> -> vector<16x32xf32>
    %cst_13 = arith.constant 5.000000e-01 : f32
    %8 = vector.broadcast %cst_13 : f32 to vector<16x32xf32>
    %9 = arith.mulf %8, %7 : vector<16x32xf32>
    %10 = math.tanh %9 : vector<16x32xf32>
    %cst_14 = arith.constant 5.000000e-01 : f32
    %11 = vector.broadcast %cst_14 : f32 to vector<16x32xf32>
    %12 = arith.mulf %11, %10 : vector<16x32xf32>
    %cst_15 = arith.constant 5.000000e-01 : f32
    %13 = vector.broadcast %cst_15 : f32 to vector<16x32xf32>
    %14 = arith.addf %12, %13 : vector<16x32xf32>
    %15 = arith.truncf %14 : vector<16x32xf32> to vector<16x32xbf16>
    %cst_16 = arith.constant dense<0.000000e+00> : vector<16x32xf32>
    %16 = tpu.matmul %15, %1, %cst_16 {dimension_numbers = #tpu.dot_dimension_numbers<[1], [0], [0], [1], [0, 0, 1, 1], [], []>} : vector<16x32xbf16>, vector<32x32xbf16>, vector<16x32xf32> -> vector<16x32xf32>
    %cst_17 = arith.constant 5.000000e-01 : f32
    %17 = vector.broadcast %cst_17 : f32 to vector<16x32xf32>
    %18 = arith.mulf %17, %16 : vector<16x32xf32>
    %19 = math.tanh %18 : vector<16x32xf32>
    %cst_18 = arith.constant 5.000000e-01 : f32
    %20 = vector.broadcast %cst_18 : f32 to vector<16x32xf32>
    %21 = arith.mulf %20, %19 : vector<16x32xf32>
    %cst_19 = arith.constant 5.000000e-01 : f32
    %22 = vector.broadcast %cst_19 : f32 to vector<16x32xf32>
    %23 = arith.addf %21, %22 : vector<16x32xf32>
    %24 = arith.truncf %23 : vector<16x32xf32> to vector<16x32xbf16>
    %cst_20 = arith.constant dense<0.000000e+00> : vector<16x10xf32>
    %25 = tpu.matmul %24, %2, %cst_20 {dimension_numbers = #tpu.dot_dimension_numbers<[1], [0], [0], [1], [0, 0, 1, 1], [], []>} : vector<16x32xbf16>, vector<32x10xbf16>, vector<16x10xf32> -> vector<16x10xf32>
    %cst_21 = arith.constant 5.000000e-01 : f32
    %26 = vector.broadcast %cst_21 : f32 to vector<16x10xf32>
    %27 = arith.mulf %26, %25 : vector<16x10xf32>
    %28 = math.tanh %27 : vector<16x10xf32>
    %cst_22 = arith.constant 5.000000e-01 : f32
    %29 = vector.broadcast %cst_22 : f32 to vector<16x10xf32>
    %30 = arith.mulf %29, %28 : vector<16x10xf32>
    %cst_23 = arith.constant 5.000000e-01 : f32
    %31 = vector.broadcast %cst_23 : f32 to vector<16x10xf32>
    %32 = arith.addf %30, %31 : vector<16x10xf32>
    %33 = arith.truncf %32 : vector<16x10xf32> to vector<16x10xbf16>
    %34 = arith.addf %33, %33 : vector<16x10xbf16>
    %cst_24 = arith.constant dense<0.000000e+00> : vector<16x32xf32>
    %35 = tpu.matmul %34, %5, %cst_24 {dimension_numbers = #tpu.dot_dimension_numbers<[1], [0], [0], [1], [0, 0, 1, 1], [], []>} : vector<16x10xbf16>, vector<10x32xbf16>, vector<16x32xf32> -> vector<16x32xf32>
    %cst_25 = arith.constant 5.000000e-01 : f32
    %36 = vector.broadcast %cst_25 : f32 to vector<16x32xf32>
    %37 = arith.mulf %36, %35 : vector<16x32xf32>
    %38 = math.tanh %37 : vector<16x32xf32>
    %cst_26 = arith.constant 5.000000e-01 : f32
    %39 = vector.broadcast %cst_26 : f32 to vector<16x32xf32>
    %40 = arith.mulf %39, %38 : vector<16x32xf32>
    %cst_27 = arith.constant 5.000000e-01 : f32
    %41 = vector.broadcast %cst_27 : f32 to vector<16x32xf32>
    %42 = arith.addf %40, %41 : vector<16x32xf32>
    %43 = arith.truncf %42 : vector<16x32xf32> to vector<16x32xbf16>
    %44 = arith.addf %43, %24 : vector<16x32xbf16>
    %cst_28 = arith.constant dense<0.000000e+00> : vector<16x32xf32>
    %45 = tpu.matmul %44, %4, %cst_28 {dimension_numbers = #tpu.dot_dimension_numbers<[1], [0], [0], [1], [0, 0, 1, 1], [], []>} : vector<16x32xbf16>, vector<32x32xbf16>, vector<16x32xf32> -> vector<16x32xf32>
    %cst_29 = arith.constant 5.000000e-01 : f32
    %46 = vector.broadcast %cst_29 : f32 to vector<16x32xf32>
    %47 = arith.mulf %46, %45 : vector<16x32xf32>
    %48 = math.tanh %47 : vector<16x32xf32>
    %cst_30 = arith.constant 5.000000e-01 : f32
    %49 = vector.broadcast %cst_30 : f32 to vector<16x32xf32>
    %50 = arith.mulf %49, %48 : vector<16x32xf32>
    %cst_31 = arith.constant 5.000000e-01 : f32
    %51 = vector.broadcast %cst_31 : f32 to vector<16x32xf32>
    %52 = arith.addf %50, %51 : vector<16x32xf32>
    %53 = arith.truncf %52 : vector<16x32xf32> to vector<16x32xbf16>
    %54 = arith.addf %53, %15 : vector<16x32xbf16>
    %cst_32 = arith.constant dense<0.000000e+00> : vector<16x256xf32>
    %55 = tpu.matmul %54, %3, %cst_32 {dimension_numbers = #tpu.dot_dimension_numbers<[1], [0], [0], [1], [0, 0, 1, 1], [], []>} : vector<16x32xbf16>, vector<32x256xbf16>, vector<16x256xf32> -> vector<16x256xf32>
    %cst_33 = arith.constant 5.000000e-01 : f32
    %56 = vector.broadcast %cst_33 : f32 to vector<16x256xf32>
    %57 = arith.mulf %56, %55 : vector<16x256xf32>
    %58 = math.tanh %57 : vector<16x256xf32>
    %cst_34 = arith.constant 5.000000e-01 : f32
    %59 = vector.broadcast %cst_34 : f32 to vector<16x256xf32>
    %60 = arith.mulf %59, %58 : vector<16x256xf32>
    %cst_35 = arith.constant 5.000000e-01 : f32
    %61 = vector.broadcast %cst_35 : f32 to vector<16x256xf32>
    %62 = arith.addf %60, %61 : vector<16x256xf32>
    %63 = arith.truncf %62 : vector<16x256xf32> to vector<16x256xbf16>
    %64 = arith.addf %63, %63 : vector<16x256xbf16>
    %65 = arith.extf %64 : vector<16x256xbf16> to vector<16x256xf32>
    %cst_36 = arith.constant dense<0.000000e+00> : vector<16x32xf32>
    %66 = tpu.matmul %65, %0, %cst_36 {dimension_numbers = #tpu.dot_dimension_numbers<[1], [0], [0], [1], [0, 0, 1, 1], [], []>} : vector<16x256xf32>, vector<256x32xf32>, vector<16x32xf32> -> vector<16x32xf32>
    %cst_37 = arith.constant 5.000000e-01 : f32
    %67 = vector.broadcast %cst_37 : f32 to vector<16x32xf32>
    %68 = arith.mulf %67, %66 : vector<16x32xf32>
    %69 = math.tanh %68 : vector<16x32xf32>
    %cst_38 = arith.constant 5.000000e-01 : f32
    %70 = vector.broadcast %cst_38 : f32 to vector<16x32xf32>
    %71 = arith.mulf %70, %69 : vector<16x32xf32>
    %cst_39 = arith.constant 5.000000e-01 : f32
    %72 = vector.broadcast %cst_39 : f32 to vector<16x32xf32>
    %73 = arith.addf %71, %72 : vector<16x32xf32>
    %74 = arith.truncf %73 : vector<16x32xf32> to vector<16x32xbf16>
    %75 = arith.addf %74, %53 : vector<16x32xbf16>
    %cst_40 = arith.constant dense<0.000000e+00> : vector<16x32xf32>
    %76 = tpu.matmul %75, %1, %cst_40 {dimension_numbers = #tpu.dot_dimension_numbers<[1], [0], [0], [1], [0, 0, 1, 1], [], []>} : vector<16x32xbf16>, vector<32x32xbf16>, vector<16x32xf32> -> vector<16x32xf32>
    %cst_41 = arith.constant 5.000000e-01 : f32
    %77 = vector.broadcast %cst_41 : f32 to vector<16x32xf32>
    %78 = arith.mulf %77, %76 : vector<16x32xf32>
    %79 = math.tanh %78 : vector<16x32xf32>
    %cst_42 = arith.constant 5.000000e-01 : f32
    %80 = vector.broadcast %cst_42 : f32 to vector<16x32xf32>
    %81 = arith.mulf %80, %79 : vector<16x32xf32>
    %cst_43 = arith.constant 5.000000e-01 : f32
    %82 = vector.broadcast %cst_43 : f32 to vector<16x32xf32>
    %83 = arith.addf %81, %82 : vector<16x32xf32>
    %84 = arith.truncf %83 : vector<16x32xf32> to vector<16x32xbf16>
    %85 = arith.addf %84, %43 : vector<16x32xbf16>
    %cst_44 = arith.constant dense<0.000000e+00> : vector<16x10xf32>
    %86 = tpu.matmul %85, %2, %cst_44 {dimension_numbers = #tpu.dot_dimension_numbers<[1], [0], [0], [1], [0, 0, 1, 1], [], []>} : vector<16x32xbf16>, vector<32x10xbf16>, vector<16x10xf32> -> vector<16x10xf32>
    %cst_45 = arith.constant 5.000000e-01 : f32
    %87 = vector.broadcast %cst_45 : f32 to vector<16x10xf32>
    %88 = arith.mulf %87, %86 : vector<16x10xf32>
    %89 = math.tanh %88 : vector<16x10xf32>
    %cst_46 = arith.constant 5.000000e-01 : f32
    %90 = vector.broadcast %cst_46 : f32 to vector<16x10xf32>
    %91 = arith.mulf %90, %89 : vector<16x10xf32>
    %cst_47 = arith.constant 5.000000e-01 : f32
    %92 = vector.broadcast %cst_47 : f32 to vector<16x10xf32>
    %93 = arith.addf %91, %92 : vector<16x10xf32>
    %94 = arith.truncf %93 : vector<16x10xf32> to vector<16x10xbf16>
    %95 = arith.addf %94, %94 : vector<16x10xbf16>
    %cst_48 = arith.constant dense<0.000000e+00> : vector<16x32xf32>
    %96 = tpu.matmul %95, %5, %cst_48 {dimension_numbers = #tpu.dot_dimension_numbers<[1], [0], [0], [1], [0, 0, 1, 1], [], []>} : vector<16x10xbf16>, vector<10x32xbf16>, vector<16x32xf32> -> vector<16x32xf32>
    %cst_49 = arith.constant 5.000000e-01 : f32
    %97 = vector.broadcast %cst_49 : f32 to vector<16x32xf32>
    %98 = arith.mulf %97, %96 : vector<16x32xf32>
    %99 = math.tanh %98 : vector<16x32xf32>
    %cst_50 = arith.constant 5.000000e-01 : f32
    %100 = vector.broadcast %cst_50 : f32 to vector<16x32xf32>
    %101 = arith.mulf %100, %99 : vector<16x32xf32>
    %cst_51 = arith.constant 5.000000e-01 : f32
    %102 = vector.broadcast %cst_51 : f32 to vector<16x32xf32>
    %103 = arith.addf %101, %102 : vector<16x32xf32>
    %104 = arith.truncf %103 : vector<16x32xf32> to vector<16x32xbf16>
    %105 = arith.addf %104, %84 : vector<16x32xbf16>
    %cst_52 = arith.constant dense<0.000000e+00> : vector<16x32xf32>
    %106 = tpu.matmul %105, %4, %cst_52 {dimension_numbers = #tpu.dot_dimension_numbers<[1], [0], [0], [1], [0, 0, 1, 1], [], []>} : vector<16x32xbf16>, vector<32x32xbf16>, vector<16x32xf32> -> vector<16x32xf32>
    %cst_53 = arith.constant 5.000000e-01 : f32
    %107 = vector.broadcast %cst_53 : f32 to vector<16x32xf32>
    %108 = arith.mulf %107, %106 : vector<16x32xf32>
    %109 = math.tanh %108 : vector<16x32xf32>
    %cst_54 = arith.constant 5.000000e-01 : f32
    %110 = vector.broadcast %cst_54 : f32 to vector<16x32xf32>
    %111 = arith.mulf %110, %109 : vector<16x32xf32>
    %cst_55 = arith.constant 5.000000e-01 : f32
    %112 = vector.broadcast %cst_55 : f32 to vector<16x32xf32>
    %113 = arith.addf %111, %112 : vector<16x32xf32>
    %114 = arith.truncf %113 : vector<16x32xf32> to vector<16x32xbf16>
    %115 = arith.addf %114, %74 : vector<16x32xbf16>
    %cst_56 = arith.constant dense<0.000000e+00> : vector<16x256xf32>
    %116 = tpu.matmul %115, %3, %cst_56 {dimension_numbers = #tpu.dot_dimension_numbers<[1], [0], [0], [1], [0, 0, 1, 1], [], []>} : vector<16x32xbf16>, vector<32x256xbf16>, vector<16x256xf32> -> vector<16x256xf32>
    %cst_57 = arith.constant 5.000000e-01 : f32
    %117 = vector.broadcast %cst_57 : f32 to vector<16x256xf32>
    %118 = arith.mulf %117, %116 : vector<16x256xf32>
    %119 = math.tanh %118 : vector<16x256xf32>
    %cst_58 = arith.constant 5.000000e-01 : f32
    %120 = vector.broadcast %cst_58 : f32 to vector<16x256xf32>
    %121 = arith.mulf %120, %119 : vector<16x256xf32>
    %cst_59 = arith.constant 5.000000e-01 : f32
    %122 = vector.broadcast %cst_59 : f32 to vector<16x256xf32>
    %123 = arith.addf %121, %122 : vector<16x256xf32>
    %124 = arith.truncf %123 : vector<16x256xf32> to vector<16x256xbf16>
    %125 = arith.addf %124, %124 : vector<16x256xbf16>
    %126 = arith.extf %125 : vector<16x256xbf16> to vector<16x256xf32>
    %cst_60 = arith.constant dense<0.000000e+00> : vector<16x32xf32>
    %127 = tpu.matmul %126, %0, %cst_60 {dimension_numbers = #tpu.dot_dimension_numbers<[1], [0], [0], [1], [0, 0, 1, 1], [], []>} : vector<16x256xf32>, vector<256x32xf32>, vector<16x32xf32> -> vector<16x32xf32>
    %cst_61 = arith.constant 5.000000e-01 : f32
    %128 = vector.broadcast %cst_61 : f32 to vector<16x32xf32>
    %129 = arith.mulf %128, %127 : vector<16x32xf32>
    %130 = math.tanh %129 : vector<16x32xf32>
    %cst_62 = arith.constant 5.000000e-01 : f32
    %131 = vector.broadcast %cst_62 : f32 to vector<16x32xf32>
    %132 = arith.mulf %131, %130 : vector<16x32xf32>
    %cst_63 = arith.constant 5.000000e-01 : f32
    %133 = vector.broadcast %cst_63 : f32 to vector<16x32xf32>
    %134 = arith.addf %132, %133 : vector<16x32xf32>
    %135 = arith.truncf %134 : vector<16x32xf32> to vector<16x32xbf16>
    %136 = arith.addf %135, %114 : vector<16x32xbf16>
    %cst_64 = arith.constant dense<0.000000e+00> : vector<16x32xf32>
    %137 = tpu.matmul %136, %1, %cst_64 {dimension_numbers = #tpu.dot_dimension_numbers<[1], [0], [0], [1], [0, 0, 1, 1], [], []>} : vector<16x32xbf16>, vector<32x32xbf16>, vector<16x32xf32> -> vector<16x32xf32>
    %cst_65 = arith.constant 5.000000e-01 : f32
    %138 = vector.broadcast %cst_65 : f32 to vector<16x32xf32>
    %139 = arith.mulf %138, %137 : vector<16x32xf32>
    %140 = math.tanh %139 : vector<16x32xf32>
    %cst_66 = arith.constant 5.000000e-01 : f32
    %141 = vector.broadcast %cst_66 : f32 to vector<16x32xf32>
    %142 = arith.mulf %141, %140 : vector<16x32xf32>
    %cst_67 = arith.constant 5.000000e-01 : f32
    %143 = vector.broadcast %cst_67 : f32 to vector<16x32xf32>
    %144 = arith.addf %142, %143 : vector<16x32xf32>
    %145 = arith.truncf %144 : vector<16x32xf32> to vector<16x32xbf16>
    %146 = arith.addf %145, %104 : vector<16x32xbf16>
    %cst_68 = arith.constant dense<0.000000e+00> : vector<16x10xf32>
    %147 = tpu.matmul %146, %2, %cst_68 {dimension_numbers = #tpu.dot_dimension_numbers<[1], [0], [0], [1], [0, 0, 1, 1], [], []>} : vector<16x32xbf16>, vector<32x10xbf16>, vector<16x10xf32> -> vector<16x10xf32>
    %cst_69 = arith.constant 5.000000e-01 : f32
    %148 = vector.broadcast %cst_69 : f32 to vector<16x10xf32>
    %149 = arith.mulf %148, %147 : vector<16x10xf32>
    %150 = math.tanh %149 : vector<16x10xf32>
    %cst_70 = arith.constant 5.000000e-01 : f32
    %151 = vector.broadcast %cst_70 : f32 to vector<16x10xf32>
    %152 = arith.mulf %151, %150 : vector<16x10xf32>
    %cst_71 = arith.constant 5.000000e-01 : f32
    %153 = vector.broadcast %cst_71 : f32 to vector<16x10xf32>
    %154 = arith.addf %152, %153 : vector<16x10xf32>
    %155 = arith.truncf %154 : vector<16x10xf32> to vector<16x10xbf16>
    %156 = arith.addf %155, %155 : vector<16x10xbf16>
    %cst_72 = arith.constant dense<0.000000e+00> : vector<16x32xf32>
    %157 = tpu.matmul %156, %5, %cst_72 {dimension_numbers = #tpu.dot_dimension_numbers<[1], [0], [0], [1], [0, 0, 1, 1], [], []>} : vector<16x10xbf16>, vector<10x32xbf16>, vector<16x32xf32> -> vector<16x32xf32>
    %cst_73 = arith.constant 5.000000e-01 : f32
    %158 = vector.broadcast %cst_73 : f32 to vector<16x32xf32>
    %159 = arith.mulf %158, %157 : vector<16x32xf32>
    %160 = math.tanh %159 : vector<16x32xf32>
    %cst_74 = arith.constant 5.000000e-01 : f32
    %161 = vector.broadcast %cst_74 : f32 to vector<16x32xf32>
    %162 = arith.mulf %161, %160 : vector<16x32xf32>
    %cst_75 = arith.constant 5.000000e-01 : f32
    %163 = vector.broadcast %cst_75 : f32 to vector<16x32xf32>
    %164 = arith.addf %162, %163 : vector<16x32xf32>
    %165 = arith.truncf %164 : vector<16x32xf32> to vector<16x32xbf16>
    %166 = arith.addf %165, %145 : vector<16x32xbf16>
    %cst_76 = arith.constant dense<0.000000e+00> : vector<16x32xf32>
    %167 = tpu.matmul %166, %4, %cst_76 {dimension_numbers = #tpu.dot_dimension_numbers<[1], [0], [0], [1], [0, 0, 1, 1], [], []>} : vector<16x32xbf16>, vector<32x32xbf16>, vector<16x32xf32> -> vector<16x32xf32>
    %cst_77 = arith.constant 5.000000e-01 : f32
    %168 = vector.broadcast %cst_77 : f32 to vector<16x32xf32>
    %169 = arith.mulf %168, %167 : vector<16x32xf32>
    %170 = math.tanh %169 : vector<16x32xf32>
    %cst_78 = arith.constant 5.000000e-01 : f32
    %171 = vector.broadcast %cst_78 : f32 to vector<16x32xf32>
    %172 = arith.mulf %171, %170 : vector<16x32xf32>
    %cst_79 = arith.constant 5.000000e-01 : f32
    %173 = vector.broadcast %cst_79 : f32 to vector<16x32xf32>
    %174 = arith.addf %172, %173 : vector<16x32xf32>
    %175 = arith.truncf %174 : vector<16x32xf32> to vector<16x32xbf16>
    %176 = arith.addf %175, %135 : vector<16x32xbf16>
    %cst_80 = arith.constant dense<0.000000e+00> : vector<16x256xf32>
    %177 = tpu.matmul %176, %3, %cst_80 {dimension_numbers = #tpu.dot_dimension_numbers<[1], [0], [0], [1], [0, 0, 1, 1], [], []>} : vector<16x32xbf16>, vector<32x256xbf16>, vector<16x256xf32> -> vector<16x256xf32>
    %cst_81 = arith.constant 5.000000e-01 : f32
    %178 = vector.broadcast %cst_81 : f32 to vector<16x256xf32>
    %179 = arith.mulf %178, %177 : vector<16x256xf32>
    %180 = math.tanh %179 : vector<16x256xf32>
    %cst_82 = arith.constant 5.000000e-01 : f32
    %181 = vector.broadcast %cst_82 : f32 to vector<16x256xf32>
    %182 = arith.mulf %181, %180 : vector<16x256xf32>
    %cst_83 = arith.constant 5.000000e-01 : f32
    %183 = vector.broadcast %cst_83 : f32 to vector<16x256xf32>
    %184 = arith.addf %182, %183 : vector<16x256xf32>
    %c0_84 = arith.constant 0 : index
    %c0_85 = arith.constant 0 : index
    %185 = vector.load %arg8[%c0_84, %c0_85] : memref<16x256xf32, #tpu.memory_space<vmem>>, vector<16x256xf32>
    tpu.vector_store %arg8[%c0_84, %c0_85], %184 {strides = array<i32>} : memref<16x256xf32, #tpu.memory_space<vmem>>, vector<16x256xf32>,
    return
  }
  func.func @transform_0(%arg0: i32) -> (i32, i32) {
    %c0_i32 = arith.constant 0 : i32
    %c0_i32_0 = arith.constant 0 : i32
    return %arg0, %c0_i32 : i32, i32
  }
  func.func @transform_1(%arg0: i32) -> (i32, i32) {
    %c0_i32 = arith.constant 0 : i32
    %c0_i32_0 = arith.constant 0 : i32
    %c0_i32_1 = arith.constant 0 : i32
    return %c0_i32, %c0_i32_0 : i32, i32
  }
  func.func @transform_2(%arg0: i32) -> (i32, i32) {
    %c0_i32 = arith.constant 0 : i32
    %c0_i32_0 = arith.constant 0 : i32
    %c0_i32_1 = arith.constant 0 : i32
    return %c0_i32, %c0_i32_0 : i32, i32
  }
  func.func @transform_3(%arg0: i32) -> (i32, i32) {
    %c0_i32 = arith.constant 0 : i32
    %c0_i32_0 = arith.constant 0 : i32
    %c0_i32_1 = arith.constant 0 : i32
    return %c0_i32, %c0_i32_0 : i32, i32
  }
  func.func @transform_4(%arg0: i32) -> (i32, i32) {
    %c0_i32 = arith.constant 0 : i32
    %c0_i32_0 = arith.constant 0 : i32
    %c0_i32_1 = arith.constant 0 : i32
    return %c0_i32, %c0_i32_0 : i32, i32
  }
  func.func @transform_5(%arg0: i32) -> (i32, i32) {
    %c0_i32 = arith.constant 0 : i32
    %c0_i32_0 = arith.constant 0 : i32
    %c0_i32_1 = arith.constant 0 : i32
    return %c0_i32, %c0_i32_0 : i32, i32
  }
  func.func @transform_6(%arg0: i32) -> (i32, i32) {
    %c0_i32 = arith.constant 0 : i32
    %c0_i32_0 = arith.constant 0 : i32
    %c0_i32_1 = arith.constant 0 : i32
    return %c0_i32, %c0_i32_0 : i32, i32
  }
  func.func @transform_7(%arg0: i32) -> (i32, i32) {
    %c0_i32 = arith.constant 0 : i32
    %c0_i32_0 = arith.constant 0 : i32
    return %arg0, %c0_i32 : i32, i32
  }
}

</mosaic_0001>

<bundles_post_ra>
// kernel: tpu_custom_call.1
= control target key start
LH: loop header
LB: loop body
LE: loop exit
PB: predicated region body
PF: predicated region fallthrough
CT: control target
= control target key end

     0   :  { %s2156_s0 = inlined_call_operand.vmem [shape: f32[16,256], index: 0, kind: input, shape index: {}]   ;;  %s2157_s1 = inlined_call_operand.vmem [shape: f32[256,32], index: 1, kind: input, shape index: {}]   ;;  %s2158_s2 = inlined_call_operand.vmem [shape: bf16[32,32], index: 2, kind: input, shape index: {}]   ;;  %s2159_s3 = inlined_call_operand.vmem [shape: bf16[32,10], index: 3, kind: input, shape index: {}]   ;;  %s2160_s4 = inlined_call_operand.vmem [shape: bf16[32,256], index: 4, kind: input, shape index: {}]   ;;  %s2161_s5 = inlined_call_operand.vmem [shape: bf16[32,32], index: 5, kind: input, shape index: {}]   ;;  %s2162_s6 = inlined_call_operand.vmem [shape: bf16[10,32], index: 6, kind: input, shape index: {}]   ;;  %s2163_s7 = inlined_call_operand.hbm [shape: f32[16,256], index: 7, kind: output, shape index: {}]  }
   0x1   :  { %v1709_v0 = vld [vmem:[%s2157_s1 + $0xf8] sm:$0xff]  ;;  %v1719_v2 = vld [vmem:[%s2157_s1 + $0xf0] sm:$0xff]  ;;  %v1731_v4 = vld [vmem:[%s2157_s1 + $0xe8] sm:$0xff] }
   0x2   :  { %v1714_v1 = vld [vmem:[%s2157_s1 + $0x78] sm:$0xff]  ;;  %1298 = vmatprep.subr.mxu0 %v1709_v0  ;;  %v1725_v3 = vld [vmem:[%s2157_s1 + $0x70] sm:$0xff]  ;;  %v1737_v5 = vld [vmem:[%s2157_s1 + $0x68] sm:$0xff] }
   0x3   :  { %1299 = vmatpush3.msra.mxu0 %v1714_v1  ;;  %v1743_v6 = vld [vmem:[%s2157_s1 + $0xe0] sm:$0xff]  ;;  %v1755_v8 = vld [vmem:[%s2157_s1 + $0xd8] sm:$0xff]  ;;  %v1767_v10 = vld [vmem:[%s2157_s1 + $0xd0] sm:$0xff] }
   0x4   :  { %1300 = vmatprep.subr.mxu0 %v1719_v2  ;;  %v1749_v7 = vld [vmem:[%s2157_s1 + $0x60] sm:$0xff]  ;;  %v1761_v9 = vld [vmem:[%s2157_s1 + $0x58] sm:$0xff]  ;;  %v1773_v11 = vld [vmem:[%s2157_s1 + $0x50] sm:$0xff] }
   0x5   :  { %1301 = vmatpush3.msra.mxu0 %v1725_v3  ;;  %v1779_v12 = vld [vmem:[%s2157_s1 + $0xc8] sm:$0xff]  ;;  %v1793_v15 = vld [vmem:[%s2157_s1 + $0xc0] sm:$0xff]  ;;  %v1804_v17 = vld [vmem:[%s2157_s1 + $0xb8] sm:$0xff] }
   0x6   :  { %1302 = vmatprep.subr.mxu0 %v1731_v4  ;;  %v79_v13 = vld [vmem:[%s2156_s0 + $0x8] sm:$0xff]  ;;  %v1798_v16 = vld [vmem:[%s2157_s1 + $0x40] sm:$0xff]  ;;  %v1810_v18 = vld [vmem:[%s2157_s1 + $0x38] sm:$0xff] }
   0x7   :  { %1303 = vmatpush3.msra.mxu0 %v1737_v5  ;;  %v1788_v14 = vld [vmem:[%s2157_s1 + $0x48] sm:$0xff]  ;;  %146 = vmatprep.mubr.f32.mxu0 %v79_v13  ;;  %v1816_v19 = vld [vmem:[%s2157_s1 + $0xb0] sm:$0xff] }
   0x8   :  { %1304 = vmatprep.subr.mxu0 %v1743_v6  ;;  %v1822_v20 = vld [vmem:[%s2157_s1 + $0x30] sm:$0xff]  ;;  %v1830_v21 = vld [vmem:[%s2157_s1 + $0xa8] sm:$0xff] }
   0x9   :  { %1305 = vmatpush3.msra.mxu0 %v1749_v7 }
   0xa   :  { %1306 = vmatprep.subr.mxu0 %v1755_v8 }
   0xb   :  { %1307 = vmatpush3.msra.mxu0 %v1761_v9 }
   0xc   :  { %1308 = vmatprep.subr.mxu0 %v1767_v10 }
   0xd   :  { %1309 = vmatpush3.msra.mxu0 %v1773_v11 }
   0xe   :  { %1310 = vmatprep.subr.mxu0 %v1779_v12 }
   0xf   :  { %1311 = vmatpush3.msra.mxu0 %v1788_v14 }
  0x10   :  { %1312 = vmatprep.subr.mxu0 %v1793_v15 }
  0x11   :  { %1313 = vmatpush3.msra.mxu0 %v1798_v16 }
  0x12   :  { %1314 = vmatprep.subr.mxu0 %v1804_v17 }
  0x13   :  { %1315 = vmatpush3.msra.mxu0 %v1810_v18 }
  0x14   :  { %12 = vsyncpa [#allocation3], 0  ;;  %1316 = vmatprep.subr.mxu0 %v1816_v19  ;;  %v1836_v22 = vld [vmem:[%s2157_s1 + $0x28] sm:$0xff]  ;;  %v1842_v23 = vld [vmem:[%s2157_s1 + $0xa0] sm:$0xff]  ;;  %v2164_v37 = vmov 0.0   ;;  %vm1661_vm0 = vmmov 0  }
  0x15   :  { %1317 = vmatpush3.msra.mxu0 %v1822_v20  ;;  %v1848_v24 = vld [vmem:[%s2157_s1 + $0x20] sm:$0xff]  ;;  %v1854_v25 = vld [vmem:[%s2157_s1 + $0x98] sm:$0xff]  ;;  %v1866_v27 = vld [vmem:[%s2157_s1 + $0x90] sm:$0xff]  ;;  %1445 = vmatprep.subr.bf16.mxu1 %v2164_v37  ;;  %vm178_vm1 = vcmask 261120   ;;  %vm307_vm2 = vcmask 1044480   ;;  %vm303_vm3 = vcmask 80896  }
  0x16   :  { %1318 = vmatprep.subr.mxu0 %v1830_v21  ;;  %v1860_v26 = vld [vmem:[%s2157_s1 + $0x18] sm:$0xff]  ;;  %v1872_v28 = vld [vmem:[%s2157_s1 + $0x10] sm:$0xff]  ;;  %v1878_v29 = vld [vmem:[%s2157_s1 + $0x88] sm:$0xff]  ;;  %1449 = vmatprep.mubr.msk.bf16.mxu1 %vm1661_vm0, %v2164_v37 }
  0x17   :  { %1319 = vmatpush3.msra.mxu0 %v1836_v22  ;;  %v1884_v30 = vld [vmem:[%s2157_s1 + $0x8] sm:$0xff]  ;;  %v1890_v31 = vld [vmem:[%s2157_s1 + $0x80] sm:$0xff]  ;;  %v81_v34 = vld [vmem:[%s2156_s0 + $0x18] sm:$0xff] }
  0x18   :  { %1320 = vmatprep.subr.mxu0 %v1842_v23  ;;  %v1896_v32 = vld [vmem:[%s2157_s1] sm:$0xff]  ;;  %v80_v35 = vld [vmem:[%s2156_s0 + $0x10] sm:$0xff]  ;;  %v1913_v36 = vld [vmem:[%s2158_s2 + $0x8] sm:$0xff]  }
  0x19   :  { %1321 = vmatpush3.msra.mxu0 %v1848_v24  ;;  %v78_v33 = vld [vmem:[%s2156_s0] sm:$0xff]  ;;  %1446 = vmatpush3.bf16.msra.mxu1 %v1913_v36  ;;  %v1936_v54 = vld [vmem:[%s2159_s3 + $0x8] sm:$0xff]  }
  0x1a   :  { %1322 = vmatprep.subr.mxu0 %v1854_v25  ;;  %1447 = vmatprep.subr.bf16.mxu1 %v2164_v37  ;;  %v1921_v38 = vld [vmem:[%s2158_s2] sm:$0xff]  }
  0x1b   :  { %1323 = vmatpush3.msra.mxu0 %v1860_v26  ;;  %2169 = vst [vmem:[#allocation5_spill] sm:$0xff] %v1921_v38  ;;  %v1943_v55 = vld [vmem:[%s2159_s3] sm:$0xff]  }
  0x1c   :  { %1324 = vmatprep.subr.mxu0 %v1866_v27 }
  0x1d   :  { %1325 = vmatpush3.msra.mxu0 %v1872_v28  ;;  %1448 = vmatpush3.bf16.msra.mxu1 %v1921_v38 }
  0x1e   :  { %1326 = vmatprep.subr.mxu0 %v1878_v29  ;;  %1453 = vmatprep.subr.bf16.mxu1 %v2164_v37 }
  0x1f   :  { %1327 = vmatpush3.msra.mxu0 %v1884_v30 }
  0x20   :  { %1328 = vmatprep.subr.mxu0 %v1890_v31 }
  0x21   :  { %1329 = vmatpush3.msra.mxu0 %v1896_v32 }
  0x22   :  { %147 = vmatmul.mubr.f32.vlgmr.msra.gmra.mxu0 %v78_v33 }
  0x23   :  { %151 = vmatprep.mubr.f32.mxu0 %v81_v34 }
  0x26   :  { %152 = vmatmul.mubr.f32.gmra.mxu0 %v80_v35 }
  0xe2   :  { %v1330_v39 = vpop.f32.mrf.mxu0 }
  0xe4   :  { %v1331_v40 = vpop.f32.mrf.mxu0 }
  0xe5   :  { %v1332_v41 = vadd.f32 %v1331_v40, %v1330_v39  ;;  %v1545_v40 = vld [vmem:[%s2162_s6] sm:$0x1f]  }
  0xe6   :  { %v1333_v42 = vpop.f32.mrf.mxu0 }
  0xe7   :  { %v157_v43 = vmul.f32 0.5, %v1332_v41  ;;  %v1953_v41 = vsel %vm307_vm2, %v1545_v40, 0 }
  0xe8   :  { %v1334_v44 = vpop.f32.mrf.mxu0 }
  0xe9   :  { %1554 = vtanh.f32 %v157_v43  ;;  %v1335_v45 = vadd.f32 %v1334_v44, %v1333_v42 }
  0xeb   :  { %v158_v46 = vmul.f32 0.5, %v1335_v45 }
  0xed   :  { %1556 = vtanh.f32 %v158_v46 }
  0xf6   :  { %v1555_v47 = vpop.eup %1554 }
  0xf7   :  { %v161_v48 = vmul.f32 0.5, %v1555_v47 }
  0xf9   :  { %v163_v51 = vadd.f32 0.5, %v161_v48 }
  0xfa   :  { %v1557_v49 = vpop.eup %1556 }
  0xfb   :  { %v162_v50 = vmul.f32 0.5, %v1557_v49 }
  0xfd   :  { %v164_v52 = vadd.f32 0.5, %v162_v50 }
  0xff   :  { %v1927_v53 = vpack.c.bf16 %v164_v52, %v163_v51 }
 0x101   :  { %1450 = vmatmul.mubr.msk.bf16.vlgmr.msra.gmra.mxu1 %vm178_vm1, %v1927_v53 }
 0x102   :  { %1457 = vmatprep.mubr.msk.bf16.mxu1 %vm1661_vm0, %v2164_v37  ;;  %1454 = vmatpush3.bf16.msra.mxu1 %v1936_v54 }
 0x103   :  { %1455 = vmatprep.subr.bf16.mxu1 %v2164_v37 }
 0x106   :  { %1456 = vmatpush3.bf16.msra.mxu1 %v1943_v55 }
 0x107   :  { %1461 = vmatprep.subr.bf16.mxu1 %v2164_v37 }
 0x1c1   :  { %v216_v56 = vpop.f32.mrf.mxu1 }
 0x1c2   :  { %v223_v57 = vmul.f32 0.5, %v216_v56 }
 0x1c3   :  { %v1451_v58 = vpop.f32.mrf.mxu1 }
 0x1c4   :  { %1558 = vtanh.f32 %v223_v57 }
 0x1c5   :  { %v219_v59 = vpop.f32.mrf.mxu1 }
 0x1c6   :  { %v224_v60 = vmul.f32 0.5, %v219_v59  ;;  %v1963_v59 = vld [vmem:[%s2161_s5 + $0x8] sm:$0xff]  }
 0x1c7   :  { %v1452_v61 = vpop.f32.mrf.mxu1 }
 0x1c8   :  { %1560 = vtanh.f32 %v224_v60  ;;  %v1970_v60 = vld [vmem:[%s2161_s5] sm:$0xff]  }
 0x1d1   :  { %v1559_v62 = vpop.eup %1558 }
 0x1d2   :  { %v227_v63 = vmul.f32 0.5, %v1559_v62 }
 0x1d4   :  { %v229_v34 = vadd.f32 0.5, %v227_v63 }
 0x1d5   :  { %v1561_v13 = vpop.eup %1560 }
 0x1d6   :  { %v228_v33 = vmul.f32 0.5, %v1561_v13 }
 0x1d8   :  { %v230_v35 = vadd.f32 0.5, %v228_v33 }
 0x1da   :  { %v231_v39 = vpack.c.bf16 %v230_v35, %v229_v34 }
 0x1dc   :  { %1458 = vmatmul.mubr.msk.bf16.vlgmr.msra.gmra.mxu1 %vm178_vm1, %v231_v39 }
 0x1dd   :  { %1463 = vmatprep.mubr.msk.bf16.mxu1 %vm1661_vm0, %v2164_v37  ;;  %1462 = vmatpush3.bf16.msra.mxu1 %v1953_v41 }
 0x1de   :  { %1467 = vmatprep.subr.bf16.mxu1 %v2164_v37 }
 0x29c   :  { %v281_v42 = vpop.f32.mrf.mxu1 }
 0x29d   :  { %v288_v43 = vmul.f32 0.5, %v281_v42 }
 0x29e   :  { %v1459_v44 = vpop.f32.mrf.mxu1 }
 0x29f   :  { %1562 = vtanh.f32 %v288_v43 }
 0x2a0   :  { %v284_v45 = vpop.f32.mrf.mxu1 }
 0x2a1   :  { %v289_v46 = vmul.f32 0.5, %v284_v45 }
 0x2a2   :  { %v1460_v47 = vpop.f32.mrf.mxu1 }
 0x2a3   :  { %1564 = vtanh.f32 %v289_v46 }
 0x2ac   :  { %v1563_v48 = vpop.eup %1562 }
 0x2ad   :  { %v292_v49 = vmul.f32 0.5, %v1563_v48  ;;  %v2017_v48 = vld [vmem:[%s2160_s4 + $0x10] ss:$8 sps:$4 sm:$0xff]  }
 0x2af   :  { %v294_v52 = vadd.f32 0.5, %v292_v49  ;;  %v2025_v49 = vld [vmem:[%s2160_s4 + $0x4] ss:$8 sps:$4 sm:$0xff]  }
 0x2b0   :  { %v1565_v50 = vpop.eup %1564 }
 0x2b1   :  { %v293_v51 = vmul.f32 0.5, %v1565_v50  ;;  %v2030_v50 = vld [vmem:[%s2160_s4] ss:$8 sps:$4 sm:$0xff]  }
 0x2b3   :  { %v295_v56 = vadd.f32 0.5, %v293_v51  ;;  %v2166_v51 = vmov 0  }
 0x2b4   :  { %483 = vmatprep.mubr.bf16.mxu0 %v2166_v51 }
 0x2b5   :  { %v296_v57 = vpack.c.bf16 %v295_v56, %v294_v52 }
 0x2b7   :  { %v297_v58 = vadd.bf16 %v296_v57, %v296_v57 }
 0x2b9   :  { %1464 = vmatmul.mubr.msk.bf16.vlgmr.msra.gmra.mxu1 %vm303_vm3, %v297_v58 }
 0x2ba   :  { %1471 = vmatprep.mubr.msk.bf16.mxu1 %vm1661_vm0, %v2164_v37  ;;  %1468 = vmatpush3.bf16.msra.mxu1 %v1963_v59 }
 0x2bb   :  { %1469 = vmatprep.subr.bf16.mxu1 %v2164_v37 }
 0x2be   :  { %1470 = vmatpush3.bf16.msra.mxu1 %v1970_v60 }
 0x2bf   :  { %1347 = vmatprep.subr.mxu1 %v1709_v0 }
 0x379   :  { %v345_v61 = vpop.f32.mrf.mxu1 }
 0x37a   :  { %v352_v62 = vmul.f32 0.5, %v345_v61 }
 0x37b   :  { %v1465_v63 = vpop.f32.mrf.mxu1 }
 0x37c   :  { %1566 = vtanh.f32 %v352_v62 }
 0x37d   :  { %v348_v13 = vpop.f32.mrf.mxu1 }
 0x37e   :  { %v353_v33 = vmul.f32 0.5, %v348_v13 }
 0x37f   :  { %v1466_v34 = vpop.f32.mrf.mxu1 }
 0x380   :  { %1568 = vtanh.f32 %v353_v33 }
 0x389   :  { %v1567_v35 = vpop.eup %1566 }
 0x38a   :  { %v356_v40 = vmul.f32 0.5, %v1567_v35 }
 0x38c   :  { %v358_v44 = vadd.f32 0.5, %v356_v40 }
 0x38d   :  { %v1569_v42 = vpop.eup %1568 }
 0x38e   :  { %v357_v43 = vmul.f32 0.5, %v1569_v42 }
 0x390   :  { %v359_v45 = vadd.f32 0.5, %v357_v43 }
 0x392   :  { %v1974_v46 = vpack.c.bf16 %v359_v45, %v358_v44 }
 0x394   :  { %v361_v47 = vadd.bf16 %v1974_v46, %v231_v39  ;;  %v2012_v39 = vld [vmem:[%s2160_s4 + $0x14] ss:$8 sps:$4 sm:$0xff]   ;;  %s1663_s4 = smov [#allocation2]  }
 0x395   :  { %463 = vmatprep.subr.bf16.mxu0 %v2012_v39  ;;  %s1261_s20 = sshll.u32 %s1663_s4, 4  ;;  %s1262_s20 = int_to_ptr.vmem [resolvable:$true] %s1261_s20 }
 0x396   :  { %1472 = vmatmul.mubr.msk.bf16.vlgmr.msra.gmra.mxu1 %vm178_vm1, %v361_v47  ;;  %464 = vmatpush1.bf16.msra.mxu0 %v2017_v48  ;;  %s1638_s21 = scalar_lea.vmem %s1262_s20, 512  ;;  %p1643_p1 = scmp.lt.s32.totalorder %s1262_s20, %s1262_s20 }
 0x397   :  { %1348 = vmatpush3.msra.mxu1 %v1714_v1  ;;  %465 = vmatprep.subr.bf16.mxu0 %v2025_v49  ;;  %p1639_p0 = scmp.ne.s32.totalorder %s1262_s20, %s1638_s21  ;;  %p1644_p2 = scmp.lt.s32.totalorder %s1638_s21, %s1638_s21 }
 0x398   :  { %1349 = vmatprep.subr.mxu1 %v1719_v2 }
 0x399   :  { %1350 = vmatpush3.msra.mxu1 %v1725_v3  ;;  %p1645_p3 = por %p1644_p2, %p1643_p1 }
 0x39a   :  { %1351 = vmatprep.subr.mxu1 %v1731_v4  ;;  %466 = vmatpush1.bf16.msra.mxu0 %v2030_v50 }
 0x39b   :  { %1352 = vmatpush3.msra.mxu1 %v1737_v5  ;;  %1475 = vmatprep.subr.bf16.mxu0 %v2164_v37  ;;  %p1646_p4 = pnand %p1645_p3, %p1639_p0 }
 0x39c   :  { %1353 = vmatprep.subr.mxu1 %v1743_v6 }
 0x39d   :  { %1354 = vmatpush3.msra.mxu1 %v1749_v7 }
 0x39e   :  { %1355 = vmatprep.subr.mxu1 %v1755_v8 }
 0x39f   :  { %1356 = vmatpush3.msra.mxu1 %v1761_v9 }
 0x3a0   :  { %1357 = vmatprep.subr.mxu1 %v1767_v10 }
 0x3a1   :  { %1358 = vmatpush3.msra.mxu1 %v1773_v11 }
 0x3a2   :  { %1359 = vmatprep.subr.mxu1 %v1779_v12 }
 0x3a3   :  { %1360 = vmatpush3.msra.mxu1 %v1788_v14 }
 0x3a4   :  { %1361 = vmatprep.subr.mxu1 %v1793_v15 }
 0x3a5   :  { %1362 = vmatpush3.msra.mxu1 %v1798_v16 }
 0x3a6   :  { %1363 = vmatprep.subr.mxu1 %v1804_v17 }
 0x3a7   :  { %1364 = vmatpush3.msra.mxu1 %v1810_v18 }
 0x3a8   :  { %1365 = vmatprep.subr.mxu1 %v1816_v19 }
 0x3a9   :  { %1366 = vmatpush3.msra.mxu1 %v1822_v20 }
 0x3aa   :  { %1367 = vmatprep.subr.mxu1 %v1830_v21 }
 0x3ab   :  { %1368 = vmatpush3.msra.mxu1 %v1836_v22 }
 0x3ac   :  { %1369 = vmatprep.subr.mxu1 %v1842_v23 }
 0x3ad   :  { %1370 = vmatpush3.msra.mxu1 %v1848_v24 }
 0x3ae   :  { %1371 = vmatprep.subr.mxu1 %v1854_v25 }
 0x3af   :  { %1372 = vmatpush3.msra.mxu1 %v1860_v26 }
 0x3b0   :  { %1373 = vmatprep.subr.mxu1 %v1866_v27 }
 0x3b1   :  { %1374 = vmatpush3.msra.mxu1 %v1872_v28 }
 0x3b2   :  { %1375 = vmatprep.subr.mxu1 %v1878_v29 }
 0x3b3   :  { %1376 = vmatpush3.msra.mxu1 %v1884_v30 }
 0x3b4   :  { %1377 = vmatprep.subr.mxu1 %v1890_v31 }
 0x3b5   :  { %1378 = vmatpush3.msra.mxu1 %v1896_v32 }
 0x3b6   :  { %834 = vmatprep.subr.bf16.mxu1 %v2012_v39 }
 0x456   :  { %v411_v52 = vpop.f32.mrf.mxu1 }
 0x457   :  { %v418_v56 = vmul.f32 0.5, %v411_v52 }
 0x458   :  { %v1473_v57 = vpop.f32.mrf.mxu1 }
 0x459   :  { %1570 = vtanh.f32 %v418_v56 }
 0x45a   :  { %v414_v58 = vpop.f32.mrf.mxu1 }
 0x45b   :  { %v419_v61 = vmul.f32 0.5, %v414_v58 }
 0x45c   :  { %v1474_v62 = vpop.f32.mrf.mxu1 }
 0x45d   :  { %1572 = vtanh.f32 %v419_v61 }
 0x466   :  { %v1571_v63 = vpop.eup %1570 }
 0x467   :  { %v422_v13 = vmul.f32 0.5, %v1571_v63 }
 0x469   :  { %v424_v35 = vadd.f32 0.5, %v422_v13 }
 0x46a   :  { %v1573_v33 = vpop.eup %1572 }
 0x46b   :  { %v423_v34 = vmul.f32 0.5, %v1573_v33 }
 0x46d   :  { %v425_v40 = vadd.f32 0.5, %v423_v34 }
 0x46f   :  { %v2036_v42 = vpack.c.bf16 %v425_v40, %v424_v35 }
 0x471   :  { %v427_v43 = vadd.bf16 %v2036_v42, %v1927_v53 }
 0x473   :  { %1287 = vmatmul.mubr.msk.bf16.vlgmr.msra.gmra.mxu0 %vm178_vm1, %v427_v43 }
 0x474   :  { %1476 = vmatpush3.bf16.msra.mxu0 %v1913_v36  ;;  %1479 = vmatprep.mubr.msk.bf16.mxu0 %vm1661_vm0, %v2164_v37 }
 0x475   :  { %1477 = vmatprep.subr.bf16.mxu0 %v2164_v37 }
 0x478   :  { %1478 = vmatpush3.bf16.msra.mxu0 %v1921_v38 }
 0x479   :  { %1483 = vmatprep.subr.bf16.mxu0 %v2164_v37 }
 0x533   :  { %v485_v44 = vpop.f32.mrf.mxu0 }
 0x534   :  { %v494_v45 = vmul.f32 0.5, %v485_v44 }
 0x535   :  { %v487_v47 = vpop.f32.mrf.mxu0 }
 0x536   :  { %1574 = vtanh.f32 %v494_v45  ;;  %v495_v52 = vmul.f32 0.5, %v487_v47 }
 0x537   :  { %v489_v56 = vpop.f32.mrf.mxu0 }
 0x538   :  { %1576 = vtanh.f32 %v495_v52  ;;  %v496_v53 = vmul.f32 0.5, %v489_v56 }
 0x539   :  { %v491_v57 = vpop.f32.mrf.mxu0 }
 0x53a   :  { %1578 = vtanh.f32 %v496_v53  ;;  %v497_v58 = vmul.f32 0.5, %v491_v57 }
 0x53c   :  { %1580 = vtanh.f32 %v497_v58 }
 0x543   :  { %v1575_v61 = vpop.eup %1574 }
 0x544   :  { %v502_v63 = vmul.f32 0.5, %v1575_v61  ;;  %v2170_v61 = vmov 0  }
 0x545   :  { %v1577_v62 = vpop.eup %1576 }
 0x546   :  { %v503_v33 = vmul.f32 0.5, %v1577_v62  ;;  %v506_v40 = vadd.f32 0.5, %v502_v63  ;;  %v2171_v62 = vmov 0.0  }
 0x547   :  { %v1579_v13 = vpop.eup %1578 }
 0x548   :  { %v504_v34 = vmul.f32 0.5, %v1579_v13  ;;  %v507_v37 = vadd.f32 0.5, %v503_v33 }
 0x549   :  { %v1581_v35 = vpop.eup %1580 }
 0x54a   :  { %v508_v43 = vadd.f32 0.5, %v504_v34  ;;  %v505_v44 = vmul.f32 0.5, %v1581_v35 }
 0x54c   :  { %v510_v45 = vpack.c.bf16 %v508_v43, %v506_v40  ;;  %v509_v47 = vadd.f32 0.5, %v505_v44 }
 0x54e   :  { %v511_v51 = vpack.c.bf16 %v509_v47, %v507_v37  ;;  %v512_v52 = vadd.bf16 %v510_v45, %v510_v45 }
 0x550   :  { %v513_v56 = vadd.bf16 %v511_v51, %v511_v51  ;;  %v514_v53 = vunpack.c.l.bf16 %v512_v52  ;;  %v516_v58 = vunpack.c.h.bf16 %v512_v52 }
 0x552   :  { %v515_v38 = vunpack.c.l.bf16 %v513_v56  ;;  %v517_v57 = vunpack.c.h.bf16 %v513_v56 }
 0x554   :  { %582 = vmatprep.mubr.f32.mxu1 %v515_v38 }
 0x555   :  { %583 = vmatmul.mubr.f32.vlgmr.msra.gmra.mxu1 %v514_v53 }
 0x556   :  { %587 = vmatprep.mubr.f32.mxu1 %v517_v57  ;;  %835 = vmatpush1.bf16.msra.mxu1 %v2017_v48 }
 0x557   :  { %836 = vmatprep.subr.bf16.mxu1 %v2025_v49 }
 0x559   :  { %588 = vmatmul.mubr.f32.gmra.mxu1 %v516_v58 }
 0x55a   :  { %837 = vmatpush1.bf16.msra.mxu1 %v2030_v50  ;;  %854 = vmatprep.mubr.bf16.mxu1 %v2170_v61 }
 0x55b   :  { %1505 = vmatprep.subr.bf16.mxu1 %v2171_v62 }
 0x615   :  { %v1379_v37 = vpop.f32.mrf.mxu1 }
 0x617   :  { %v1380_v51 = vpop.f32.mrf.mxu1 }
 0x618   :  { %v1381_v63 = vadd.f32 %v1380_v51, %v1379_v37 }
 0x619   :  { %v1382_v13 = vpop.f32.mrf.mxu1 }
 0x61a   :  { %v593_v38 = vmul.f32 0.5, %v1381_v63 }
 0x61b   :  { %v1383_v33 = vpop.f32.mrf.mxu1 }
 0x61c   :  { %1582 = vtanh.f32 %v593_v38  ;;  %v1384_v34 = vadd.f32 %v1383_v33, %v1382_v13 }
 0x61e   :  { %v594_v35 = vmul.f32 0.5, %v1384_v34 }
 0x620   :  { %1584 = vtanh.f32 %v594_v35 }
 0x629   :  { %v1583_v40 = vpop.eup %1582 }
 0x62a   :  { %v597_v43 = vmul.f32 0.5, %v1583_v40 }
 0x62c   :  { %v599_v47 = vadd.f32 0.5, %v597_v43 }
 0x62d   :  { %v1585_v44 = vpop.eup %1584 }
 0x62e   :  { %v598_v45 = vmul.f32 0.5, %v1585_v44 }
 0x630   :  { %v600_v52 = vadd.f32 0.5, %v598_v45 }
 0x632   :  { %v2052_v56 = vpack.c.bf16 %v600_v52, %v599_v47 }
 0x634   :  { %v602_v53 = vadd.bf16 %v2052_v56, %v2036_v42 }
 0x636   :  { %1480 = vmatmul.mubr.msk.bf16.vlgmr.msra.gmra.mxu0 %vm178_vm1, %v602_v53 }
 0x637   :  { %1484 = vmatpush3.bf16.msra.mxu0 %v1936_v54  ;;  %1487 = vmatprep.mubr.msk.bf16.mxu0 %vm1661_vm0, %v2171_v62 }
 0x638   :  { %1485 = vmatprep.subr.bf16.mxu0 %v2171_v62 }
 0x63b   :  { %1486 = vmatpush3.bf16.msra.mxu0 %v1943_v55 }
 0x63c   :  { %1491 = vmatprep.subr.bf16.mxu0 %v2171_v62 }
 0x6f6   :  { %v640_v57 = vpop.f32.mrf.mxu0 }
 0x6f7   :  { %v647_v58 = vmul.f32 0.5, %v640_v57 }
 0x6f8   :  { %v1481_v37 = vpop.f32.mrf.mxu0 }
 0x6f9   :  { %1586 = vtanh.f32 %v647_v58 }
 0x6fa   :  { %v643_v51 = vpop.f32.mrf.mxu0 }
 0x6fb   :  { %v648_v63 = vmul.f32 0.5, %v643_v51 }
 0x6fc   :  { %v1482_v42 = vpop.f32.mrf.mxu0 }
 0x6fd   :  { %1588 = vtanh.f32 %v648_v63 }
 0x706   :  { %v1587_v13 = vpop.eup %1586 }
 0x707   :  { %v651_v38 = vmul.f32 0.5, %v1587_v13 }
 0x709   :  { %v653_v35 = vadd.f32 0.5, %v651_v38 }
 0x70a   :  { %v1589_v33 = vpop.eup %1588 }
 0x70b   :  { %v652_v34 = vmul.f32 0.5, %v1589_v33 }
 0x70d   :  { %v654_v40 = vadd.f32 0.5, %v652_v34 }
 0x70f   :  { %v655_v43 = vpack.c.bf16 %v654_v40, %v653_v35 }
 0x711   :  { %v656_v44 = vadd.bf16 %v655_v43, %v1974_v46 }
 0x713   :  { %1488 = vmatmul.mubr.msk.bf16.vlgmr.msra.gmra.mxu0 %vm178_vm1, %v656_v44 }
 0x714   :  { %1492 = vmatpush3.bf16.msra.mxu0 %v1953_v41  ;;  %1493 = vmatprep.mubr.msk.bf16.mxu0 %vm1661_vm0, %v2171_v62 }
 0x715   :  { %1497 = vmatprep.subr.bf16.mxu0 %v2171_v62 }
 0x7d3   :  { %v694_v45 = vpop.f32.mrf.mxu0 }
 0x7d4   :  { %v701_v47 = vmul.f32 0.5, %v694_v45 }
 0x7d5   :  { %v1489_v52 = vpop.f32.mrf.mxu0 }
 0x7d6   :  { %1590 = vtanh.f32 %v701_v47 }
 0x7d7   :  { %v697_v53 = vpop.f32.mrf.mxu0 }
 0x7d8   :  { %v702_v57 = vmul.f32 0.5, %v697_v53 }
 0x7d9   :  { %v1490_v58 = vpop.f32.mrf.mxu0 }
 0x7da   :  { %1592 = vtanh.f32 %v702_v57 }
 0x7e3   :  { %v1591_v37 = vpop.eup %1590 }
 0x7e4   :  { %v705_v51 = vmul.f32 0.5, %v1591_v37 }
 0x7e6   :  { %v707_v42 = vadd.f32 0.5, %v705_v51 }
 0x7e7   :  { %v1593_v46 = vpop.eup %1592 }
 0x7e8   :  { %v706_v63 = vmul.f32 0.5, %v1593_v46 }
 0x7ea   :  { %v708_v13 = vadd.f32 0.5, %v706_v63 }
 0x7ec   :  { %v709_v38 = vpack.c.bf16 %v708_v13, %v707_v42 }
 0x7ee   :  { %v710_v33 = vadd.bf16 %v709_v38, %v709_v38 }
 0x7f0   :  { %1494 = vmatmul.mubr.msk.bf16.vlgmr.msra.gmra.mxu0 %vm303_vm3, %v710_v33 }
 0x7f1   :  { %1498 = vmatpush3.bf16.msra.mxu0 %v1963_v59  ;;  %1501 = vmatprep.mubr.msk.bf16.mxu0 %vm1661_vm0, %v2171_v62 }
 0x7f2   :  { %1499 = vmatprep.subr.bf16.mxu0 %v2171_v62 }
 0x7f5   :  { %1500 = vmatpush3.bf16.msra.mxu0 %v1970_v60 }
 0x7f6   :  { %1396 = vmatprep.subr.mxu0 %v1709_v0 }
 0x8b0   :  { %v748_v34 = vpop.f32.mrf.mxu0 }
 0x8b1   :  { %v755_v35 = vmul.f32 0.5, %v748_v34 }
 0x8b2   :  { %v1495_v40 = vpop.f32.mrf.mxu0 }
 0x8b3   :  { %1594 = vtanh.f32 %v755_v35 }
 0x8b4   :  { %v751_v44 = vpop.f32.mrf.mxu0 }
 0x8b5   :  { %v756_v45 = vmul.f32 0.5, %v751_v44 }
 0x8b6   :  { %v1496_v47 = vpop.f32.mrf.mxu0 }
 0x8b7   :  { %1596 = vtanh.f32 %v756_v45 }
 0x8c0   :  { %v1595_v52 = vpop.eup %1594 }
 0x8c1   :  { %v759_v53 = vmul.f32 0.5, %v1595_v52 }
 0x8c3   :  { %v761_v37 = vadd.f32 0.5, %v759_v53 }
 0x8c4   :  { %v1597_v57 = vpop.eup %1596 }
 0x8c5   :  { %v760_v58 = vmul.f32 0.5, %v1597_v57 }
 0x8c7   :  { %v762_v51 = vadd.f32 0.5, %v760_v58 }
 0x8c9   :  { %v2076_v46 = vpack.c.bf16 %v762_v51, %v761_v37 }
 0x8cb   :  { %v764_v63 = vadd.bf16 %v2076_v46, %v655_v43 }
 0x8cd   :  { %1502 = vmatmul.mubr.msk.bf16.vlgmr.msra.gmra.mxu0 %vm178_vm1, %v764_v63 }
 0x8ce   :  { %1397 = vmatpush3.msra.mxu0 %v1714_v1 }
 0x8cf   :  { %1398 = vmatprep.subr.mxu0 %v1719_v2 }
 0x8d0   :  { %1399 = vmatpush3.msra.mxu0 %v1725_v3 }
 0x8d1   :  { %1400 = vmatprep.subr.mxu0 %v1731_v4 }
 0x8d2   :  { %1401 = vmatpush3.msra.mxu0 %v1737_v5 }
 0x8d3   :  { %1402 = vmatprep.subr.mxu0 %v1743_v6 }
 0x8d4   :  { %1403 = vmatpush3.msra.mxu0 %v1749_v7 }
 0x8d5   :  { %1404 = vmatprep.subr.mxu0 %v1755_v8 }
 0x8d6   :  { %1405 = vmatpush3.msra.mxu0 %v1761_v9 }
 0x8d7   :  { %1406 = vmatprep.subr.mxu0 %v1767_v10 }
 0x8d8   :  { %1407 = vmatpush3.msra.mxu0 %v1773_v11 }
 0x8d9   :  { %1408 = vmatprep.subr.mxu0 %v1779_v12 }
 0x8da   :  { %1409 = vmatpush3.msra.mxu0 %v1788_v14 }
 0x8db   :  { %1410 = vmatprep.subr.mxu0 %v1793_v15  ;;  %v2172_v15 = vld [vmem:[#allocation5_spill] sm:$0xff] }
 0x8dc   :  { %1411 = vmatpush3.msra.mxu0 %v1798_v16 }
 0x8dd   :  { %1412 = vmatprep.subr.mxu0 %v1804_v17 }
 0x8de   :  { %1413 = vmatpush3.msra.mxu0 %v1810_v18 }
 0x8df   :  { %1414 = vmatprep.subr.mxu0 %v1816_v19 }
 0x8e0   :  { %1415 = vmatpush3.msra.mxu0 %v1822_v20 }
 0x8e1   :  { %1416 = vmatprep.subr.mxu0 %v1830_v21 }
 0x8e2   :  { %1417 = vmatpush3.msra.mxu0 %v1836_v22 }
 0x8e3   :  { %1418 = vmatprep.subr.mxu0 %v1842_v23 }
 0x8e4   :  { %1419 = vmatpush3.msra.mxu0 %v1848_v24 }
 0x8e5   :  { %1420 = vmatprep.subr.mxu0 %v1854_v25 }
 0x8e6   :  { %1421 = vmatpush3.msra.mxu0 %v1860_v26 }
 0x8e7   :  { %1422 = vmatprep.subr.mxu0 %v1866_v27 }
 0x8e8   :  { %1423 = vmatpush3.msra.mxu0 %v1872_v28 }
 0x8e9   :  { %1424 = vmatprep.subr.mxu0 %v1878_v29 }
 0x8ea   :  { %1425 = vmatpush3.msra.mxu0 %v1884_v30 }
 0x8eb   :  { %1426 = vmatprep.subr.mxu0 %v1890_v31 }
 0x8ec   :  { %1427 = vmatpush3.msra.mxu0 %v1896_v32 }
 0x8ed   :  { %1205 = vmatprep.subr.bf16.mxu0 %v2012_v39 }
 0x98d   :  { %v802_v0 = vpop.f32.mrf.mxu0 }
 0x98e   :  { %v809_v1 = vmul.f32 0.5, %v802_v0 }
 0x98f   :  { %v1503_v2 = vpop.f32.mrf.mxu0 }
 0x990   :  { %1598 = vtanh.f32 %v809_v1 }
 0x991   :  { %v805_v3 = vpop.f32.mrf.mxu0 }
 0x992   :  { %v810_v4 = vmul.f32 0.5, %v805_v3 }
 0x993   :  { %v1504_v5 = vpop.f32.mrf.mxu0 }
 0x994   :  { %1600 = vtanh.f32 %v810_v4 }
 0x99d   :  { %v1599_v6 = vpop.eup %1598 }
 0x99e   :  { %v813_v7 = vmul.f32 0.5, %v1599_v6 }
 0x9a0   :  { %v815_v10 = vadd.f32 0.5, %v813_v7 }
 0x9a1   :  { %v1601_v8 = vpop.eup %1600 }
 0x9a2   :  { %v814_v9 = vmul.f32 0.5, %v1601_v8 }
 0x9a4   :  { %v816_v11 = vadd.f32 0.5, %v814_v9 }
 0x9a6   :  { %v2112_v12 = vpack.c.bf16 %v816_v11, %v815_v10 }
 0x9a8   :  { %v818_v14 = vadd.bf16 %v2112_v12, %v2052_v56 }
 0x9aa   :  { %1292 = vmatmul.mubr.msk.bf16.vlgmr.msra.gmra.mxu1 %vm178_vm1, %v818_v14 }
 0x9ab   :  { %1506 = vmatpush3.bf16.msra.mxu1 %v1913_v36  ;;  %1509 = vmatprep.mubr.msk.bf16.mxu1 %vm1661_vm0, %v2171_v62 }
 0x9ac   :  { %1507 = vmatprep.subr.bf16.mxu1 %v2171_v62 }
 0x9af   :  { %1508 = vmatpush3.bf16.msra.mxu1 %v2172_v15 }
 0x9b0   :  { %1513 = vmatprep.subr.bf16.mxu1 %v2171_v62 }
 0xa6a   :  { %v856_v16 = vpop.f32.mrf.mxu1 }
 0xa6b   :  { %v865_v17 = vmul.f32 0.5, %v856_v16 }
 0xa6c   :  { %v858_v18 = vpop.f32.mrf.mxu1 }
 0xa6d   :  { %1602 = vtanh.f32 %v865_v17  ;;  %v866_v19 = vmul.f32 0.5, %v858_v18 }
 0xa6e   :  { %v860_v20 = vpop.f32.mrf.mxu1 }
 0xa6f   :  { %1604 = vtanh.f32 %v866_v19  ;;  %v867_v21 = vmul.f32 0.5, %v860_v20 }
 0xa70   :  { %v862_v22 = vpop.f32.mrf.mxu1 }
 0xa71   :  { %1606 = vtanh.f32 %v867_v21  ;;  %v868_v23 = vmul.f32 0.5, %v862_v22 }
 0xa73   :  { %1608 = vtanh.f32 %v868_v23 }
 0xa7a   :  { %v1603_v24 = vpop.eup %1602 }
 0xa7b   :  { %v873_v26 = vmul.f32 0.5, %v1603_v24 }
 0xa7c   :  { %v1605_v25 = vpop.eup %1604 }
 0xa7d   :  { %v874_v28 = vmul.f32 0.5, %v1605_v25  ;;  %v877_v31 = vadd.f32 0.5, %v873_v26 }
 0xa7e   :  { %v1607_v27 = vpop.eup %1606 }
 0xa7f   :  { %v875_v29 = vmul.f32 0.5, %v1607_v27  ;;  %v878_v39 = vadd.f32 0.5, %v874_v28 }
 0xa80   :  { %v1609_v30 = vpop.eup %1608 }
 0xa81   :  { %v879_v32 = vadd.f32 0.5, %v875_v29  ;;  %v876_v36 = vmul.f32 0.5, %v1609_v30 }
 0xa83   :  { %v881_v56 = vpack.c.bf16 %v879_v32, %v877_v31  ;;  %v880_v43 = vadd.f32 0.5, %v876_v36 }
 0xa85   :  { %v882_v42 = vpack.c.bf16 %v880_v43, %v878_v39  ;;  %v883_v13 = vadd.bf16 %v881_v56, %v881_v56 }
 0xa87   :  { %v884_v38 = vadd.bf16 %v882_v42, %v882_v42  ;;  %v885_v34 = vunpack.c.l.bf16 %v883_v13  ;;  %v887_v40 = vunpack.c.h.bf16 %v883_v13 }
 0xa89   :  { %v886_v33 = vunpack.c.l.bf16 %v884_v38  ;;  %v888_v35 = vunpack.c.h.bf16 %v884_v38 }
 0xa8b   :  { %953 = vmatprep.mubr.f32.mxu0 %v886_v33 }
 0xa8c   :  { %954 = vmatmul.mubr.f32.vlgmr.msra.gmra.mxu0 %v885_v34 }
 0xa8d   :  { %958 = vmatprep.mubr.f32.mxu0 %v888_v35  ;;  %1206 = vmatpush1.bf16.msra.mxu0 %v2017_v48 }
 0xa8e   :  { %1207 = vmatprep.subr.bf16.mxu0 %v2025_v49 }
 0xa90   :  { %959 = vmatmul.mubr.f32.gmra.mxu0 %v887_v40 }
 0xa91   :  { %1208 = vmatpush1.bf16.msra.mxu0 %v2030_v50  ;;  %1225 = vmatprep.mubr.bf16.mxu0 %v2170_v61 }
 0xb4c   :  { %v1428_v44 = vpop.f32.mrf.mxu0 }
 0xb4e   :  { %v1429_v45 = vpop.f32.mrf.mxu0 }
 0xb4f   :  { %v1430_v47 = vadd.f32 %v1429_v45, %v1428_v44 }
 0xb50   :  { %v1431_v52 = vpop.f32.mrf.mxu0 }
 0xb51   :  { %v964_v53 = vmul.f32 0.5, %v1430_v47 }
 0xb52   :  { %v1432_v57 = vpop.f32.mrf.mxu0 }
 0xb53   :  { %1610 = vtanh.f32 %v964_v53  ;;  %v1433_v58 = vadd.f32 %v1432_v57, %v1431_v52 }
 0xb55   :  { %v965_v37 = vmul.f32 0.5, %v1433_v58 }
 0xb57   :  { %1612 = vtanh.f32 %v965_v37 }
 0xb60   :  { %v1611_v51 = vpop.eup %1610 }
 0xb61   :  { %v968_v48 = vmul.f32 0.5, %v1611_v51 }
 0xb63   :  { %v970_v49 = vadd.f32 0.5, %v968_v48 }
 0xb64   :  { %v1613_v63 = vpop.eup %1612 }
 0xb65   :  { %v969_v0 = vmul.f32 0.5, %v1613_v63 }
 0xb67   :  { %v971_v1 = vadd.f32 0.5, %v969_v0 }
 0xb69   :  { %v2127_v2 = vpack.c.bf16 %v971_v1, %v970_v49 }
 0xb6b   :  { %v973_v50 = vadd.bf16 %v2127_v2, %v2112_v12 }
 0xb6d   :  { %1510 = vmatmul.mubr.msk.bf16.vlgmr.msra.gmra.mxu1 %vm178_vm1, %v973_v50 }
 0xb6e   :  { %1514 = vmatpush3.bf16.msra.mxu1 %v1936_v54  ;;  %1517 = vmatprep.mubr.msk.bf16.mxu1 %vm1661_vm0, %v2171_v62 }
 0xb6f   :  { %1515 = vmatprep.subr.bf16.mxu1 %v2171_v62 }
 0xb72   :  { %1516 = vmatpush3.bf16.msra.mxu1 %v1943_v55 }
 0xb73   :  { %1521 = vmatprep.subr.bf16.mxu1 %v2171_v62 }
 0xc2d   :  { %v1011_v61 = vpop.f32.mrf.mxu1 }
 0xc2e   :  { %v1018_v3 = vmul.f32 0.5, %v1011_v61 }
 0xc2f   :  { %v1511_v4 = vpop.f32.mrf.mxu1 }
 0xc30   :  { %1614 = vtanh.f32 %v1018_v3 }
 0xc31   :  { %v1014_v5 = vpop.f32.mrf.mxu1 }
 0xc32   :  { %v1019_v6 = vmul.f32 0.5, %v1014_v5 }
 0xc33   :  { %v1512_v7 = vpop.f32.mrf.mxu1 }
 0xc34   :  { %1616 = vtanh.f32 %v1019_v6 }
 0xc3d   :  { %v1615_v8 = vpop.eup %1614 }
 0xc3e   :  { %v1022_v9 = vmul.f32 0.5, %v1615_v8 }
 0xc40   :  { %v1024_v11 = vadd.f32 0.5, %v1022_v9 }
 0xc41   :  { %v1617_v54 = vpop.eup %1616 }
 0xc42   :  { %v1023_v10 = vmul.f32 0.5, %v1617_v54 }
 0xc44   :  { %v1025_v12 = vadd.f32 0.5, %v1023_v10 }
 0xc46   :  { %v1026_v14 = vpack.c.bf16 %v1025_v12, %v1024_v11 }
 0xc48   :  { %v1027_v15 = vadd.bf16 %v1026_v14, %v2076_v46 }
 0xc4a   :  { %1518 = vmatmul.mubr.msk.bf16.vlgmr.msra.gmra.mxu1 %vm178_vm1, %v1027_v15 }
 0xc4b   :  { %1522 = vmatpush3.bf16.msra.mxu1 %v1953_v41  ;;  %1523 = vmatprep.mubr.msk.bf16.mxu1 %vm1661_vm0, %v2171_v62 }
 0xc4c   :  { %1527 = vmatprep.subr.bf16.mxu1 %v2171_v62 }
 0xd0a   :  { %v1065_v55 = vpop.f32.mrf.mxu1 }
 0xd0b   :  { %v1072_v16 = vmul.f32 0.5, %v1065_v55 }
 0xd0c   :  { %v1519_v17 = vpop.f32.mrf.mxu1 }
 0xd0d   :  { %1618 = vtanh.f32 %v1072_v16 }
 0xd0e   :  { %v1068_v18 = vpop.f32.mrf.mxu1 }
 0xd0f   :  { %v1073_v19 = vmul.f32 0.5, %v1068_v18 }
 0xd10   :  { %v1520_v20 = vpop.f32.mrf.mxu1 }
 0xd11   :  { %1620 = vtanh.f32 %v1073_v19 }
 0xd1a   :  { %v1619_v21 = vpop.eup %1618 }
 0xd1b   :  { %v1076_v22 = vmul.f32 0.5, %v1619_v21 }
 0xd1d   :  { %v1078_v24 = vadd.f32 0.5, %v1076_v22 }
 0xd1e   :  { %v1621_v46 = vpop.eup %1620 }
 0xd1f   :  { %v1077_v23 = vmul.f32 0.5, %v1621_v46 }
 0xd21   :  { %v1079_v25 = vadd.f32 0.5, %v1077_v23 }
 0xd23   :  { %v1080_v41 = vpack.c.bf16 %v1079_v25, %v1078_v24 }
 0xd25   :  { %v1081_v26 = vadd.bf16 %v1080_v41, %v1080_v41 }
 0xd27   :  { %1524 = vmatmul.mubr.msk.bf16.vlgmr.msra.gmra.mxu1 %vm303_vm3, %v1081_v26 }
 0xd28   :  { %1528 = vmatpush3.bf16.msra.mxu1 %v1963_v59  ;;  %1531 = vmatprep.mubr.msk.bf16.mxu1 %vm1661_vm0, %v2171_v62 }
 0xd29   :  { %1529 = vmatprep.subr.bf16.mxu1 %v2171_v62 }
 0xd2c   :  { %1530 = vmatpush3.bf16.msra.mxu1 %v1970_v60 }
 0xde7   :  { %v1119_v27 = vpop.f32.mrf.mxu1 }
 0xde8   :  { %v1126_v28 = vmul.f32 0.5, %v1119_v27 }
 0xde9   :  { %v1525_v29 = vpop.f32.mrf.mxu1 }
 0xdea   :  { %1622 = vtanh.f32 %v1126_v28 }
 0xdeb   :  { %v1122_v30 = vpop.f32.mrf.mxu1 }
 0xdec   :  { %v1127_v31 = vmul.f32 0.5, %v1122_v30 }
 0xded   :  { %v1526_v32 = vpop.f32.mrf.mxu1 }
 0xdee   :  { %1624 = vtanh.f32 %v1127_v31 }
 0xdf7   :  { %v1623_v36 = vpop.eup %1622 }
 0xdf8   :  { %v1130_v39 = vmul.f32 0.5, %v1623_v36 }
 0xdfa   :  { %v1132_v59 = vadd.f32 0.5, %v1130_v39 }
 0xdfb   :  { %v1625_v56 = vpop.eup %1624 }
 0xdfc   :  { %v1131_v43 = vmul.f32 0.5, %v1625_v56 }
 0xdfe   :  { %v1133_v42 = vadd.f32 0.5, %v1131_v43 }
 0xe00   :  { %v1134_v13 = vpack.c.bf16 %v1133_v42, %v1132_v59 }
 0xe02   :  { %v1135_v38 = vadd.bf16 %v1134_v13, %v1026_v14 }
 0xe04   :  { %1532 = vmatmul.mubr.msk.bf16.vlgmr.msra.gmra.mxu1 %vm178_vm1, %v1135_v38 }
 0xec4   :  { %v1173_v62 = vpop.f32.mrf.mxu1 }
 0xec5   :  { %v1180_v60 = vmul.f32 0.5, %v1173_v62 }
 0xec6   :  { %v1533_v33 = vpop.f32.mrf.mxu1 }
 0xec7   :  { %1626 = vtanh.f32 %v1180_v60 }
 0xec8   :  { %v1176_v34 = vpop.f32.mrf.mxu1 }
 0xec9   :  { %v1181_v35 = vmul.f32 0.5, %v1176_v34 }
 0xeca   :  { %v1534_v40 = vpop.f32.mrf.mxu1 }
 0xecb   :  { %1628 = vtanh.f32 %v1181_v35 }
 0xed4   :  { %v1627_v44 = vpop.eup %1626 }
 0xed5   :  { %v1184_v45 = vmul.f32 0.5, %v1627_v44 }
 0xed7   :  { %v1186_v53 = vadd.f32 0.5, %v1184_v45 }
 0xed8   :  { %v1629_v47 = vpop.eup %1628 }
 0xed9   :  { %v1185_v52 = vmul.f32 0.5, %v1629_v47 }
 0xedb   :  { %v1187_v57 = vadd.f32 0.5, %v1185_v52 }
 0xedd   :  { %v1188_v58 = vpack.c.bf16 %v1187_v57, %v1186_v53 }
 0xedf   :  { %v1189_v37 = vadd.bf16 %v1188_v58, %v2127_v2 }
 0xee1   :  { %1297 = vmatmul.mubr.msk.bf16.vlgmr.msra.gmra.mxu0 %vm178_vm1, %v1189_v37 }
 0xfa1   :  { %v1227_v51 = vpop.f32.mrf.mxu0 }
 0xfa2   :  { %v1236_v48 = vmul.f32 0.5, %v1227_v51 }
 0xfa3   :  { %v1229_v63 = vpop.f32.mrf.mxu0 }
 0xfa4   :  { %1630 = vtanh.f32 %v1236_v48  ;;  %v1237_v0 = vmul.f32 0.5, %v1229_v63 }
 0xfa5   :  { %v1231_v49 = vpop.f32.mrf.mxu0 }
 0xfa6   :  { %1632 = vtanh.f32 %v1237_v0  ;;  %v1238_v1 = vmul.f32 0.5, %v1231_v49 }
 0xfa7   :  { %v1233_v50 = vpop.f32.mrf.mxu0 }
 0xfa8   :  { %1634 = vtanh.f32 %v1238_v1  ;;  %v1239_v61 = vmul.f32 0.5, %v1233_v50 }
 0xfaa   :  { %1636 = vtanh.f32 %v1239_v61 }
 0xfb1   :  { %v1631_v3 = vpop.eup %1630 }
 0xfb2   :  { %v1244_v4 = vmul.f32 0.5, %v1631_v3 }
 0xfb3   :  { %v1633_v5 = vpop.eup %1632 }
 0xfb4   :  { %v1248_v6 = vadd.f32 0.5, %v1244_v4  ;;  %v1245_v7 = vmul.f32 0.5, %v1633_v5 }
 0xfb5   :  { %v1635_v2 = vpop.eup %1634 }
 0xfb6   :  { %1252 = vst [vmem:[#allocation2] sm:$0xff] %v1248_v6  ;;  %v1249_v8 = vadd.f32 0.5, %v1245_v7  ;;  %v1246_v9 = vmul.f32 0.5, %v1635_v2 }
 0xfb7   :  { %v1637_v54 = vpop.eup %1636 }
 0xfb8   :  { %1253 = vst [vmem:[#allocation2 + $0x8] sm:$0xff] %v1249_v8  ;;  %v1250_v10 = vadd.f32 0.5, %v1246_v9  ;;  %v1247_v11 = vmul.f32 0.5, %v1637_v54 }
 0xfba   :  { %1254 = vst [vmem:[#allocation2 + $0x10] sm:$0xff] %v1250_v10  ;;  %v1251_v12 = vadd.f32 0.5, %v1247_v11 }
 0xfbc   :  { %1255 = vst [vmem:[#allocation2 + $0x18] sm:$0xff] %v1251_v12 }
 0xfbd   :  { %1649 = shalt.err (!%p1646_p4)
}
 0xfbe   :  { %s1664_s22 = smov 256   ;;  %s1665_s23 = smov 16  }
 0xfbf   :  { %1267 = dma.vmem_to_hbm [thread:$0]  %s1262_s20, 512, %s2163_s7, [#allocation3], %s1664_s22, %s1664_s22, %s1665_s23  }
 0xfc0   :  { %1658 = dma.done.wait [#allocation3], 512  }
 0xfc1   :  { %1659 = vsyncadd [#allocation3], 4294966784 }
 0xfc2   :  { %1271 = vsyncpa [#allocation3], 1 }

</bundles_post_ra>
